<compile_context>
chip_gen: v6e
topology: v6e:2x2x1
jax: 0.10.0
libtpu: 0.0.40
codegen_flags: <defaults>
</compile_context>

<pallas_src>
import functools

import jax
import jax.numpy as jnp
from jax.experimental import pallas as pl
from jax.experimental.pallas import tpu as pltpu


def _round_up(a, b):
    return (a + b - 1) // b * b


def _label_smoothing_kernel(x_ref, t_ref, out_ref, acc_ref, *,
                            smoothing, num_classes, num_valid_rows,
                            block_rows, mask_rows):
    k = pl.program_id(1)

    @pl.when(k == 0)
    def _():
        acc_ref[...] = jnp.zeros_like(acc_ref)

    x = x_ref[...].astype(jnp.float32)            # (bn, C)
    tgt = t_ref[...]                              # (bn, 1) int32

    # Numerically stable log-sum-exp (the only transcendental work).
    m = jnp.max(x, axis=-1, keepdims=True)
    lse = jnp.log(jnp.sum(jnp.exp(x - m), axis=-1, keepdims=True)) + m   # (bn,1)

    # Fused label-smoothed cross-entropy:
    #   row_loss = lse - sum_c w_c * x_c,  w = smooth_val except confidence@tgt.
    smooth_val = smoothing / (num_classes - 1)
    confidence = 1.0 - smoothing
    col = jax.lax.broadcasted_iota(jnp.int32, x.shape, dimension=1)
    weighted = jnp.where(col == tgt, confidence * x, smooth_val * x)
    row_loss = lse - jnp.sum(weighted, axis=-1, keepdims=True)           # (bn,1)

    if mask_rows:
        base = (pl.program_id(0) * pl.num_programs(1) + k) * block_rows
        row = base + jax.lax.broadcasted_iota(jnp.int32, row_loss.shape, 0)
        row_loss = jnp.where(row < num_valid_rows, row_loss, 0.0)

    # Elementwise accumulate; no per-step scalar reduce or (1,1) RMW store.
    acc_ref[...] += row_loss

    @pl.when(k == pl.num_programs(1) - 1)
    def _():
        # One cross-sublane reduction per split; 1/N scaling happens once in
        # the wrapper.
        out_ref[...] = jnp.sum(acc_ref[...], axis=0, keepdims=True)


def label_smoothing_loss(x, target, *, smoothing=0.1, block_rows=None,
                         num_splits=2, x_block_bytes=4 * 1024 * 1024):
    """x: (N, C) float (f32 or bf16), target: (N,) int.  Returns scalar f32."""
    N, C = x.shape
    itemsize = jnp.dtype(x.dtype).itemsize

    if block_rows is None:
        br = max(8, (x_block_bytes // (C * itemsize)) // 8 * 8)
        block_rows = int(min(br, 2048, _round_up(N, 8)))
    assert block_rows % 8 == 0, "block_rows must be a multiple of 8"

    n_blocks = max(1, _round_up(N, block_rows) // block_rows)
    num_splits = max(1, min(num_splits, n_blocks))
    n_blocks = _round_up(n_blocks, num_splits)
    n_pad = n_blocks * block_rows
    steps_per_split = n_blocks // num_splits

    x_p = x if n_pad == N else jnp.pad(x, ((0, n_pad - N), (0, 0)))
    t = target.astype(jnp.int32).reshape(N, 1)
    t_p = t if n_pad == N else jnp.pad(t, ((0, n_pad - N), (0, 0)))

    kernel = functools.partial(
        _label_smoothing_kernel,
        smoothing=float(smoothing),
        num_classes=C,
        num_valid_rows=N,
        block_rows=block_rows,
        mask_rows=(n_pad != N),
    )

    cost = pl.CostEstimate(
        flops=5 * n_pad * C,
        transcendentals=n_pad * C + n_pad,
        bytes_accessed=n_pad * C * itemsize + n_pad * 4 + num_splits * 4,
    )

    partial = pl.pallas_call(
        kernel,
        out_shape=jax.ShapeDtypeStruct((num_splits, 1), jnp.float32),
        grid_spec=pltpu.PrefetchScalarGridSpec(
            num_scalar_prefetch=0,
            grid=(num_splits, steps_per_split),
            in_specs=[
                pl.BlockSpec((block_rows, C),
                             lambda s, k: (s * steps_per_split + k, 0)),
                pl.BlockSpec((block_rows, 1),
                             lambda s, k: (s * steps_per_split + k, 0)),
            ],
            out_specs=pl.BlockSpec((1, 1), lambda s, k: (s, 0)),
            scratch_shapes=[pltpu.VMEM((block_rows, 1), jnp.float32)],
        ),
        compiler_params=pltpu.CompilerParams(
            dimension_semantics=("parallel", "arbitrary"),
            vmem_limit_bytes=32 * 1024 * 1024,
        ),
        cost_estimate=cost,
    )(x_p, t_p)

    return jnp.sum(partial) * (1.0 / N)


def _reference(x, target, smoothing=0.1):
    N, C = x.shape
    logp = jax.nn.log_softmax(x.astype(jnp.float32), axis=-1)
    smooth_val = smoothing / (C - 1)
    confidence = 1.0 - smoothing
    true_dist = jnp.full((N, C), smooth_val, jnp.float32)
    true_dist = true_dist.at[jnp.arange(N), target].set(confidence)
    return jnp.mean(jnp.sum(-true_dist * logp, axis=-1))


if __name__ == "__main__":
    key = jax.random.PRNGKey(0)
    kx, kt = jax.random.split(key)

    # Case 1: small, exactly tiled.
    N, C = 16, 32
    x = jax.random.normal(kx, (N, C), dtype=jnp.float32)
    target = jax.random.randint(kt, (N,), 0, C, dtype=jnp.int32)
    loss = jax.block_until_ready(label_smoothing_loss(x, target, smoothing=0.1))
    ref = _reference(x, target, smoothing=0.1)
    assert jnp.allclose(loss, ref, rtol=1e-5, atol=1e-5), (loss, ref)

    # Case 2: non-divisible N (exercises the padded-row masking path).
    N2 = 13
    x2 = jax.random.normal(kx, (N2, C), dtype=jnp.float32)
    t2 = jax.random.randint(kt, (N2,), 0, C, dtype=jnp.int32)
    loss2 = jax.block_until_ready(label_smoothing_loss(x2, t2, smoothing=0.1))
    ref2 = _reference(x2, t2, smoothing=0.1)
    assert jnp.allclose(loss2, ref2, rtol=1e-5, atol=1e-5), (loss2, ref2)

    # Case 3: multiple blocks + 2-way split (parallel axis + accumulation).
    N3 = 40
    x3 = jax.random.normal(kx, (N3, C), dtype=jnp.float32)
    t3 = jax.random.randint(kt, (N3,), 0, C, dtype=jnp.int32)
    loss3 = jax.block_until_ready(
        label_smoothing_loss(x3, t3, smoothing=0.1, block_rows=8, num_splits=2))
    ref3 = _reference(x3, t3, smoothing=0.1)
    assert jnp.allclose(loss3, ref3, rtol=1e-5, atol=1e-5), (loss3, ref3)

    # Case 4: bf16 inputs (half HBM traffic path).
    x4 = jax.random.normal(kx, (64, 128), dtype=jnp.bfloat16)
    t4 = jax.random.randint(kt, (64,), 0, 128, dtype=jnp.int32)
    loss4 = jax.block_until_ready(label_smoothing_loss(x4, t4, smoothing=0.1))
    ref4 = _reference(x4, t4, smoothing=0.1)
    assert jnp.allclose(loss4, ref4, rtol=5e-3, atol=5e-3), (loss4, ref4)

    print("KERNEL_OK")
</pallas_src>

<mosaic_0001>
module attributes {stable_mosaic.version = 11 : i64} {
  func.func @_label_smoothing_kernel(%arg0: i32, %arg1: i32, %arg2: memref<16x32xf32, #tpu.memory_space<vmem>>, %arg3: memref<16x1xi32, #tpu.memory_space<vmem>>, %arg4: memref<1x1xf32, #tpu.memory_space<vmem>>, %arg5: memref<16x1xf32, #tpu.memory_space<vmem>>) attributes {dimension_semantics = [#tpu.dimension_semantics<parallel>, #tpu.dimension_semantics<arbitrary>], iteration_bounds = array<i64: 1, 1>, scalar_prefetch = 0 : i64, scratch_operands = 1 : i64, tpu.core_type = #tpu.core_type<tc>, window_params = [{transform_indices = @transform_0, window_bounds = array<i64: 16, 32>}, {transform_indices = @transform_1, window_bounds = array<i64: 16, 1>}, {transform_indices = @transform_2, window_bounds = array<i64: 1, 1>}]} {
    %c0_i32 = arith.constant 0 : i32
    %0 = arith.cmpi eq, %arg1, %c0_i32 : i32
    %1 = arith.extui %0 : i1 to i32
    %c0_i32_0 = arith.constant 0 : i32
    %2 = arith.cmpi ne, %1, %c0_i32_0 : i32
    scf.if %2 {
      %cst_14 = arith.constant 0.000000e+00 : f32
      %31 = vector.broadcast %cst_14 : f32 to vector<16x1xf32>
      %c0_15 = arith.constant 0 : index
      %c0_16 = arith.constant 0 : index
      %32 = vector.load %arg5[%c0_15, %c0_16] : memref<16x1xf32, #tpu.memory_space<vmem>>, vector<16x1xf32>
      tpu.vector_store %arg5[%c0_15, %c0_16], %31 {strides = array<i32>} : memref<16x1xf32, #tpu.memory_space<vmem>>, vector<16x1xf32>,
    } else {
    }
    %c0 = arith.constant 0 : index
    %c0_1 = arith.constant 0 : index
    %3 = vector.load %arg2[%c0, %c0_1] : memref<16x32xf32, #tpu.memory_space<vmem>>, vector<16x32xf32>
    %c0_2 = arith.constant 0 : index
    %c0_3 = arith.constant 0 : index
    %4 = vector.load %arg3[%c0_2, %c0_3] : memref<16x1xi32, #tpu.memory_space<vmem>>, vector<16x1xi32>
    %cst = arith.constant dense<0xFF800000> : vector<16xf32>
    %5 = vector.multi_reduction <maximumf>, %3, %cst [1] : vector<16x32xf32> to vector<16xf32>
    %6 = vector.shape_cast %5 : vector<16xf32> to vector<16x1xf32>
    %7 = vector.broadcast %6 : vector<16x1xf32> to vector<16x32xf32>
    %8 = arith.subf %3, %7 : vector<16x32xf32>
    %9 = math.exp %8 : vector<16x32xf32>
    %cst_4 = arith.constant dense<0.000000e+00> : vector<16xf32>
    %10 = vector.multi_reduction <add>, %9, %cst_4 [1] : vector<16x32xf32> to vector<16xf32>
    %11 = vector.shape_cast %10 : vector<16xf32> to vector<16x1xf32>
    %12 = math.log %11 : vector<16x1xf32>
    %13 = arith.addf %12, %6 : vector<16x1xf32>
    %14 = tpu.iota {dimensions = array<i32: 1>} : vector<16x32xi32>
    %15 = vector.broadcast %4 : vector<16x1xi32> to vector<16x32xi32>
    %16 = arith.cmpi eq, %14, %15 : vector<16x32xi32>
    %cst_5 = arith.constant 0.899999976 : f32
    %17 = vector.broadcast %cst_5 : f32 to vector<16x32xf32>
    %18 = arith.mulf %17, %3 : vector<16x32xf32>
    %cst_6 = arith.constant 0.0032258064 : f32
    %19 = vector.broadcast %cst_6 : f32 to vector<16x32xf32>
    %20 = arith.mulf %19, %3 : vector<16x32xf32>
    %21 = arith.select %16, %18, %20 : vector<16x32xi1>, vector<16x32xf32>
    %cst_7 = arith.constant dense<0.000000e+00> : vector<16xf32>
    %22 = vector.multi_reduction <add>, %21, %cst_7 [1] : vector<16x32xf32> to vector<16xf32>
    %23 = vector.shape_cast %22 : vector<16xf32> to vector<16x1xf32>
    %24 = arith.subf %13, %23 : vector<16x1xf32>
    %c0_8 = arith.constant 0 : index
    %c0_9 = arith.constant 0 : index
    %25 = vector.load %arg5[%c0_8, %c0_9] : memref<16x1xf32, #tpu.memory_space<vmem>>, vector<16x1xf32>
    %26 = arith.addf %25, %24 : vector<16x1xf32>
    %c0_10 = arith.constant 0 : index
    %c0_11 = arith.constant 0 : index
    %27 = vector.load %arg5[%c0_10, %c0_11] : memref<16x1xf32, #tpu.memory_space<vmem>>, vector<16x1xf32>
    tpu.vector_store %arg5[%c0_10, %c0_11], %26 {strides = array<i32>} : memref<16x1xf32, #tpu.memory_space<vmem>>, vector<16x1xf32>,
    %c0_i32_12 = arith.constant 0 : i32
    %28 = arith.cmpi eq, %arg1, %c0_i32_12 : i32
    %29 = arith.extui %28 : i1 to i32
    %c0_i32_13 = arith.constant 0 : i32
    %30 = arith.cmpi ne, %29, %c0_i32_13 : i32
    scf.if %30 {
      %c0_14 = arith.constant 0 : index
      %c0_15 = arith.constant 0 : index
      %31 = vector.load %arg5[%c0_14, %c0_15] : memref<16x1xf32, #tpu.memory_space<vmem>>, vector<16x1xf32>
      %cst_16 = arith.constant dense<0.000000e+00> : vector<1xf32>
      %32 = vector.multi_reduction <add>, %31, %cst_16 [0] : vector<16x1xf32> to vector<1xf32>
      %33 = vector.shape_cast %32 : vector<1xf32> to vector<1x1xf32>
      %c0_17 = arith.constant 0 : index
      %c0_18 = arith.constant 0 : index
      %34 = vector.load %arg4[%c0_17, %c0_18] : memref<1x1xf32, #tpu.memory_space<vmem>>, vector<1x1xf32>
      tpu.vector_store %arg4[%c0_17, %c0_18], %33 {strides = array<i32>} : memref<1x1xf32, #tpu.memory_space<vmem>>, vector<1x1xf32>,
    } else {
    }
    return
  }
  func.func @transform_0(%arg0: i32, %arg1: i32) -> (i32, i32) {
    %c1_i32 = arith.constant 1 : i32
    %0 = arith.muli %arg0, %c1_i32 : i32
    %1 = arith.addi %0, %arg1 : i32
    %c0_i32 = arith.constant 0 : i32
    %c0_i32_0 = arith.constant 0 : i32
    return %1, %c0_i32 : i32, i32
  }
  func.func @transform_1(%arg0: i32, %arg1: i32) -> (i32, i32) {
    %c1_i32 = arith.constant 1 : i32
    %0 = arith.muli %arg0, %c1_i32 : i32
    %1 = arith.addi %0, %arg1 : i32
    %c0_i32 = arith.constant 0 : i32
    %c0_i32_0 = arith.constant 0 : i32
    return %1, %c0_i32 : i32, i32
  }
  func.func @transform_2(%arg0: i32, %arg1: i32) -> (i32, i32) {
    %c0_i32 = arith.constant 0 : i32
    %c0_i32_0 = arith.constant 0 : i32
    return %arg0, %c0_i32 : i32, i32
  }
}

</mosaic_0001>

<bundles_post_ra>
// kernel: tpu_custom_call.1
= control target key start
LH: loop header
LB: loop body
LE: loop exit
PB: predicated region body
PF: predicated region fallthrough
CT: control target
= control target key end

     0   :  { %vm67_vm0 = vcmask 261120   ;;  %v200_v4 = vmov 0   ;;  %s245_s0 = inlined_call_operand.vmem [shape: f32[16,32], index: 0, kind: input, shape index: {}]   ;;  %s246_s1 = inlined_call_operand.vmem [shape: s32[16,1], index: 1, kind: input, shape index: {}]   ;;  %s247_s2 = inlined_call_operand.hbm [shape: f32[1,1], index: 2, kind: output, shape index: {}]  }
   0x1   :  { %v63_v0 = vld [vmem:[%s245_s0] sm:$0xff]  ;;  %v64_v1 = vld [vmem:[%s245_s0 + $0x8] sm:$0xff]  ;;  %168 = vset.pattern.permute.xlu1 %v200_v4  ;;  %169 = vset.pattern.permute.xlu0 %v200_v4 }
   0x2   :  { %v65_v2 = vld [vmem:[%s246_s1] sm:$0xff]  ;;  %v68_v3 = vsel %vm67_vm0, %v63_v0, -inf }
   0x3   :  { %7 = vsyncpa [#allocation4], 0  ;;  %69 = vmax.xlane.f32.xlu0 %v68_v3  ;;  %95 = vperm.xlu1 %168, %v65_v2   ;;  %v71_v5 = vsel %vm67_vm0, %v64_v1, -inf  ;;  %v66_v6 = vld [vmem:[%s246_s1 + $0x8] sm:$0xff]  ;;  %v92_v13 = vlaneseq  ;;  %v102_v16 = vmul.f32 0.9, %v63_v0 }
   0x4   :  { %v104_v17 = vmul.f32 0.0032258064, %v63_v0  ;;  %v103_v21 = vmul.f32 0.9, %v64_v1  ;;  %v105_v22 = vmul.f32 0.0032258064, %v64_v1 }
   0x5   :  { %v93_v15 = vand.u32 127, %v92_v13  ;;  %vm60_vm3 = vcmask 7168   ;;  %v201_v29 = vmov 0.0   ;;  %s202_s0 = smov [#allocation3]   ;;  %vm137_vm4 = vcmask 0  }
   0x6   :  { %61 = vst.msk [vmem:[#allocation2] sm:$0xff] %vm60_vm3, %v201_v29  ;;  %62 = vst.msk [vmem:[#allocation2 + $0x8] sm:$0xff] %vm60_vm3, %v201_v29  ;;  %s145_s1 = sshll.u32 %s202_s0, 4  ;;  %s146_s1 = int_to_ptr.vmem [resolvable:$true] %s145_s1 }
   0x7   :  { %72 = vmax.xlane.f32.xlu0 %v71_v5  ;;  %98 = vperm.xlu1 %168, %v66_v6   ;;  %s178_s17 = scalar_lea.vmem %s146_s1, 16  ;;  %s182_s18 = scalar_lea.vmem %s146_s1, 32 }
   0x8   :  { %p179_p0 = scmp.ne.s32.totalorder %s146_s1, %s178_s17  ;;  %p183_p1 = scmp.lt.s32.totalorder %s146_s1, %s146_s1 }
   0x9   :  { %p184_p2 = scmp.lt.s32.totalorder %s182_s18, %s178_s17 }
   0xb   :  { %p185_p3 = por %p184_p2, %p183_p1 }
   0xd   :  { %v116_v37 = vld [vmem:[#allocation2] sm:$0xff]  ;;  %v117_v43 = vld [vmem:[#allocation2 + $0x8] sm:$0xff]  ;;  %p186_p4 = pnand %p185_p3, %p179_p0 }
  0x7e   :  { %v96_v14 = vpop.permute.xlu1 %95 }
  0x7f   :  { %vm100_vm1 = vcmp.eq.s32.totalorder %v93_v15, %v96_v14 }
  0x80   :  { %v106_v20 = vsel %vm100_vm1, %v102_v16, %v104_v17 }
  0x81   :  { %v108_v24 = vsel %vm67_vm0, %v106_v20, 0.0 }
  0x82   :  { %v99_v18 = vpop.permute.xlu1 %98 }
  0x83   :  { %vm101_vm2 = vcmp.eq.s32.totalorder %v93_v15, %v99_v18 }
  0x84   :  { %v107_v26 = vsel %vm101_vm2, %v103_v21, %v105_v22 }
  0x85   :  { %v111_v28 = vsel %vm67_vm0, %v107_v26, 0.0 }
  0x8c   :  { %v70_v7 = vpop.xlane.xlu0 %69 }
  0x8d   :  { %v74_v8 = vsub.f32 %v63_v0, %v70_v7 }
  0x8f   :  { %v76_v9 = vmul.f32 1.442695, %v74_v8 }
  0x90   :  { %v73_v10 = vpop.xlane.xlu0 %72 }
  0x91   :  { %170 = vpow2.f32 %v76_v9  ;;  %v75_v11 = vsub.f32 %v64_v1, %v73_v10 }
  0x93   :  { %v78_v12 = vmul.f32 1.442695, %v75_v11 }
  0x95   :  { %172 = vpow2.f32 %v78_v12 }
  0x9e   :  { %v171_v19 = vpop.eup %170 }
  0x9f   :  { %v80_v23 = vsel %vm67_vm0, %v171_v19, 0.0 }
  0xa0   :  { %81 = vadd.xlane.f32.xlu0 %v80_v23 }
  0xa2   :  { %v173_v25 = vpop.eup %172 }
  0xa3   :  { %v83_v27 = vsel %vm67_vm0, %v173_v25, 0.0 }
  0xa4   :  { %84 = vadd.xlane.f32.xlu1 %v83_v27  ;;  %109 = vadd.xlane.f32.xlu0 %v108_v24 }
  0xa8   :  { %112 = vadd.xlane.f32.xlu0 %v111_v28 }
 0x129   :  { %v82_v30 = vpop.xlane.xlu0 %81 }
 0x12a   :  { %174 = vlog2.f32 %v82_v30 }
 0x12d   :  { %v85_v31 = vpop.xlane.xlu1 %84  ;;  %v110_v34 = vpop.xlane.xlu0 %109 }
 0x12e   :  { %176 = vlog2.f32 %v85_v31 }
 0x131   :  { %v113_v42 = vpop.xlane.xlu0 %112 }
 0x137   :  { %v175_v32 = vpop.eup %174 }
 0x138   :  { %v87_v33 = vmul.f32 0.6931472, %v175_v32 }
 0x13a   :  { %v90_v35 = vadd.f32 %v87_v33, %v70_v7 }
 0x13b   :  { %v177_v36 = vpop.eup %176 }
 0x13c   :  { %v89_v38 = vmul.f32 0.6931472, %v177_v36  ;;  %v114_v39 = vsub.f32 %v90_v35, %v110_v34 }
 0x13e   :  { %v118_v40 = vadd.f32 %v116_v37, %v114_v39  ;;  %v91_v41 = vadd.f32 %v89_v38, %v73_v10 }
 0x140   :  { %121 = vst.msk [vmem:[#allocation2] sm:$0xff] %vm60_vm3, %v118_v40  ;;  %v115_v44 = vsub.f32 %v91_v41, %v113_v42 }
 0x142   :  { %v119_v45 = vadd.f32 %v117_v43, %v115_v44 }
 0x144   :  { %122 = vst.msk [vmem:[#allocation2 + $0x8] sm:$0xff] %vm60_vm3, %v119_v45 }
 0x147   :  { %v126_v46 = vld [vmem:[#allocation2] sm:$0xff] }
 0x148   :  { %v128_v48 = vsel %vm60_vm3, %v126_v46, 0.0 }
 0x14b   :  { %v127_v47 = vld [vmem:[#allocation2 + $0x8] sm:$0xff] }
 0x14c   :  { %v129_v49 = vsel %vm60_vm3, %v127_v47, 0.0 }
 0x14d   :  { %v130_v50 = vadd.f32 %v129_v49, %v128_v48 }
 0x14f   :  { %v131_v51 = vrot.slane %v130_v50, 4 }
 0x151   :  { %v132_v52 = vadd.f32 %v131_v51, %v130_v50 }
 0x153   :  { %v133_v53 = vrot.slane %v132_v52, 2 }
 0x155   :  { %v134_v54 = vadd.f32 %v133_v53, %v132_v52 }
 0x157   :  { %v135_v55 = vrot.slane %v134_v54, 1 }
 0x159   :  { %v136_v56 = vadd.f32 %v135_v55, %v134_v54 }
 0x15b   :  { %138 = vst.msk [vmem:[#allocation3] sm:$0x1] %vm137_vm4, %v136_v56 }
 0x15c   :  { %189 = shalt.err (!%p186_p4)
}
 0x15d   :  { %148 = dma.vmem_to_hbm [thread:$0]  %s146_s1, 16, %s247_s2, [#allocation4]  }
 0x15e   :  { %198 = dma.done.wait [#allocation4], 16  }
 0x15f   :  { %199 = vsyncadd [#allocation4], 4294967280 }
 0x160   :  { %152 = vsyncpa [#allocation4], 1 }

</bundles_post_ra>
